<compile_context>
chip_gen: v6e
topology: v6e:2x2x1
jax: 0.10.0
libtpu: 0.0.40
codegen_flags: <defaults>
</compile_context>

<pallas_src>
import functools

import jax
import jax.numpy as jnp
from jax.experimental import pallas as pl
from jax.experimental.pallas import tpu as pltpu


# ---------------------------------------------------------------------------
# Kernels
# ---------------------------------------------------------------------------


def _rmsd_none_kernel(x_ref, xhat_ref, out_ref, *, inv_n_atoms):
    """Per-row RMSD, full D in one block."""
    x = x_ref[...].astype(jnp.float32)
    xh = xhat_ref[...].astype(jnp.float32)
    d = xh - x                                                   # VPU
    ssq = jnp.sum(d * d, axis=1, keepdims=True)                  # (TB, 1) XLU
    out_ref[...] = jnp.sqrt(ssq * inv_n_atoms)                   # EUP sqrt


def _rmsd_mean_kernel(x_ref, xhat_ref, out_ref, acc_ref, *, batch, tb,
                      inv_n_atoms, need_mask):
    """Single-TensorCore mean path: running sum of per-row RMSDs in VMEM."""
    i = pl.program_id(0)

    @pl.when(i == 0)
    def _init():
        acc_ref[...] = jnp.zeros_like(acc_ref)

    x = x_ref[...].astype(jnp.float32)
    xh = xhat_ref[...].astype(jnp.float32)
    d = xh - x
    ssq = jnp.sum(d * d, axis=1, keepdims=True)                  # (TB, 1)
    per_row = jnp.sqrt(ssq * inv_n_atoms)

    if need_mask:  # compile-time gate: only emitted when B % TB != 0
        row_ids = i * tb + jax.lax.broadcasted_iota(jnp.int32, per_row.shape, 0)
        per_row = jnp.where(row_ids < batch, per_row, 0.0)

    acc_ref[...] += jnp.sum(per_row, axis=0, keepdims=True)      # (1, 1)

    @pl.when(i == pl.num_programs(0) - 1)
    def _finalize():
        out_ref[...] = acc_ref[...] * (1.0 / batch)


def _rmsd_none_dsplit_kernel(x_ref, xhat_ref, out_ref, ssq_ref, *, d_total, td,
                             inv_n_atoms, need_col_mask):
    """Per-row RMSD with the D (reduction) axis split across the last grid axis."""
    j = pl.program_id(1)

    @pl.when(j == 0)
    def _init():
        ssq_ref[...] = jnp.zeros_like(ssq_ref)

    x = x_ref[...].astype(jnp.float32)
    xh = xhat_ref[...].astype(jnp.float32)
    d = xh - x
    if need_col_mask:  # last D-block extends past D: drop lane-padded columns
        col_ids = j * td + jax.lax.broadcasted_iota(jnp.int32, d.shape, 1)
        d = jnp.where(col_ids < d_total, d, 0.0)
    ssq_ref[...] += jnp.sum(d * d, axis=1, keepdims=True)        # (TB, 1)

    @pl.when(j == pl.num_programs(1) - 1)
    def _finalize():
        out_ref[...] = jnp.sqrt(ssq_ref[...] * inv_n_atoms)


# ---------------------------------------------------------------------------
# Hardware queries & tile sizing
# ---------------------------------------------------------------------------


def _tpu_vmem_bytes():
    try:
        return int(pltpu.get_tpu_info().vmem_capacity_bytes)
    except Exception:
        return 64 * 1024 * 1024  # most conservative (v7x per-TensorCore)


def _num_tensorcores():
    """Best-effort TensorCore-per-device count; defaults to 1 (safe path)."""
    candidates = []
    try:
        candidates.append(pltpu.get_tpu_info())
    except Exception:
        pass
    try:
        candidates.append(jax.devices()[0])
    except Exception:
        pass
    for obj in candidates:
        for name in ("num_cores", "core_count", "num_tensorcores",
                     "tensor_core_count"):
            v = getattr(obj, name, None)
            if v is None:
                continue
            try:
                v = int(v)
            except (TypeError, ValueError):
                continue
            if v > 0:
                return v
    return 1


def _pick_tiles(batch, d, itemsize, max_rows=None, max_cols=None):
    """Pick (TB, TD) and a scoped-VMEM limit from physical VMEM size.

    TD == d  -> rows-only tiling (full D per block).
    TD <  d  -> D-split tiling (second, last, 'arbitrary' grid axis over D).
    """
    phys_vmem = _tpu_vmem_bytes()
    work_itemsize = max(int(itemsize), 4)        # f32 upcast working set
    d_lanes = pl.cdiv(d, 128) * 128              # lane-padded VMEM width

    # Streaming working-set budget (~1/2 phys VMEM: 32 MiB v7x, 64 MiB v5e/v6e)
    # and a per-input-pipeline-buffer DMA target of a few MiB so the ~0.35 us
    # per-grid-step overhead stays well under 5% of each step's DMA time.
    buf_budget = phys_vmem // 2
    per_buf_target = min(8 << 20, phys_vmem // 12)

    def rows_for_width(width_lanes):
        # 2 inputs x 2 pipeline buffers at storage dtype, plus ~2 lane-padded
        # f32 rows of compute temporaries per input row (diff / squares).
        per_row = 2 * 2 * width_lanes * itemsize + 2 * width_lanes * work_itemsize
        r = min(per_buf_target // max(width_lanes * itemsize, 1),
                buf_budget // max(per_row, 1))
        return (int(r) // 8) * 8                 # sublane-aligned

    force_dsplit = (max_cols is not None) and (int(max_cols) < d)
    tb = rows_for_width(d_lanes)

    if tb >= 8 and not force_dsplit:
        # Rows-only tiling with the full D in one block.
        td = d
        if max_rows is not None:
            tb = min(tb, max(8, (int(max_rows) // 8) * 8))
        if tb >= batch:
            tb = batch                           # single block == full batch
    else:
        # D too wide for even an (8, D) tile (or forced by the test hook):
        # tile the reduction axis in 128-lane chunks.
        tb = batch if batch < 8 else 8
        per_chunk_row = 2 * 2 * 128 * itemsize + 2 * 128 * work_itemsize
        n_chunks = min(per_buf_target // max(8 * 128 * itemsize, 1),
                       buf_budget // max(8 * per_chunk_row, 1))
        td = max(128, int(n_chunks) * 128)
        if max_cols is not None:
            td = min(td, max(128, (int(max_cols) // 128) * 128))
        if td >= d:
            td = d                               # degenerate: one D step

    vmem_limit = max(32 << 20, phys_vmem - (16 << 20))
    return tb, td, vmem_limit


# ---------------------------------------------------------------------------
# pallas_call builders
# ---------------------------------------------------------------------------


def _per_row_rmsd(x, x_hat, *, B, D, tb, td, inv_n_atoms, vmem_limit,
                  batch_sems):
    """Returns per-row RMSD as a (B,) f32 array."""

    def build(batch_sem):
        if td == D:
            kernel = functools.partial(_rmsd_none_kernel,
                                       inv_n_atoms=inv_n_atoms)
            return pl.pallas_call(
                kernel,
                out_shape=jax.ShapeDtypeStruct((B, 1), jnp.float32),
                grid_spec=pltpu.PrefetchScalarGridSpec(
                    num_scalar_prefetch=0,
                    grid=(pl.cdiv(B, tb),),
                    in_specs=[pl.BlockSpec((tb, D), lambda i: (i, 0)),
                              pl.BlockSpec((tb, D), lambda i: (i, 0))],
                    out_specs=pl.BlockSpec((tb, 1), lambda i: (i, 0)),
                ),
                compiler_params=pltpu.CompilerParams(
                    dimension_semantics=(batch_sem,),
                    vmem_limit_bytes=vmem_limit,
                ),
            )
        # D-split path: batch axis first (parallel-able), reduction axis last.
        kernel = functools.partial(
            _rmsd_none_dsplit_kernel, d_total=D, td=td,
            inv_n_atoms=inv_n_atoms, need_col_mask=(D % td != 0))
        return pl.pallas_call(
            kernel,
            out_shape=jax.ShapeDtypeStruct((B, 1), jnp.float32),
            grid_spec=pltpu.PrefetchScalarGridSpec(
                num_scalar_prefetch=0,
                grid=(pl.cdiv(B, tb), pl.cdiv(D, td)),
                in_specs=[pl.BlockSpec((tb, td), lambda i, j: (i, j)),
                          pl.BlockSpec((tb, td), lambda i, j: (i, j))],
                out_specs=pl.BlockSpec((tb, 1), lambda i, j: (i, 0)),
                scratch_shapes=[pltpu.VMEM((tb, 1), jnp.float32)],
            ),
            compiler_params=pltpu.CompilerParams(
                dimension_semantics=(batch_sem, "arbitrary"),
                vmem_limit_bytes=vmem_limit,
            ),
        )

    last_err = None
    for sem in batch_sems:  # try CORE_PARALLEL first on multi-core chips
        try:
            out = build(sem)(x, x_hat)
            return out.reshape((B,))
        except Exception as err:  # fall back to safe semantics
            last_err = err
    raise last_err


# ---------------------------------------------------------------------------
# Public wrapper
# ---------------------------------------------------------------------------


def rmsd_loss(x: jax.Array, x_hat: jax.Array, reduction: str = "mean", *,
              _max_rows_per_tile=None, _max_cols_per_tile=None) -> jax.Array:
    """RMSD loss matching the PyTorch RMSDLoss module.

    x, x_hat: (B, D) with D % 3 == 0 (D = 3 * n_atoms, flattened coordinates).
    Returns a scalar for reduction='mean', a (B,) array for reduction='none'.
    Inputs may be bf16/f32; accumulation is always f32.
    """
    assert x.shape == x_hat.shape and x.ndim == 2
    B, D = x.shape
    assert D % 3 == 0
    assert reduction in ("mean", "none")

    n_atoms = D // 3
    inv_n_atoms = 1.0 / float(n_atoms)
    itemsize = max(jnp.dtype(x.dtype).itemsize, jnp.dtype(x_hat.dtype).itemsize)
    tb, td, vmem_limit = _pick_tiles(B, D, itemsize,
                                     _max_rows_per_tile, _max_cols_per_tile)

    num_cores = _num_tensorcores()
    multicore = num_cores > 1
    if multicore:
        # CORE_PARALLEL is what actually shards the batch stream across v7x's
        # two TensorCores; "parallel" is the safe fallback.
        batch_sems = [getattr(pltpu, "CORE_PARALLEL", "parallel"), "parallel"]
    else:
        batch_sems = ["parallel"]

    use_dsplit = td < D
    use_accumulator_mean = (reduction == "mean") and (not multicore) \
        and (not use_dsplit)

    if use_accumulator_mean:
        # Single-TensorCore chips: sequential in-VMEM scalar accumulation.
        kernel = functools.partial(
            _rmsd_mean_kernel, batch=B, tb=tb, inv_n_atoms=inv_n_atoms,
            need_mask=(B % tb != 0))
        out = pl.pallas_call(
            kernel,
            out_shape=jax.ShapeDtypeStruct((1, 1), jnp.float32),
            grid_spec=pltpu.PrefetchScalarGridSpec(
                num_scalar_prefetch=0,
                grid=(pl.cdiv(B, tb),),
                in_specs=[pl.BlockSpec((tb, D), lambda i: (i, 0)),
                          pl.BlockSpec((tb, D), lambda i: (i, 0))],
                out_specs=pl.BlockSpec((1, 1), lambda i: (0, 0)),
                scratch_shapes=[pltpu.VMEM((1, 1), jnp.float32)],
            ),
            compiler_params=pltpu.CompilerParams(
                dimension_semantics=("arbitrary",),   # sequential accumulation
                vmem_limit_bytes=vmem_limit,
            ),
        )(x, x_hat)
        return out.reshape(())                        # 0-d scalar, like torch

    # Per-row RMSD (multi-core chips and/or D-split); finishing the 'mean'
    # with jnp.mean outside the kernel costs only B*4 extra HBM bytes, which
    # is negligible next to the 2*B*D input bytes, and lets both TensorCores
    # stream independent halves of the batch.
    per_row = _per_row_rmsd(x, x_hat, B=B, D=D, tb=tb, td=td,
                            inv_n_atoms=inv_n_atoms, vmem_limit=vmem_limit,
                            batch_sems=batch_sems)
    if reduction == "mean":
        return jnp.mean(per_row)
    return per_row


# ---------------------------------------------------------------------------
# Pure-JAX reference (mirrors the PyTorch module exactly)
# ---------------------------------------------------------------------------


def _rmsd_ref(x, x_hat, reduction="mean"):
    B, D = x.shape
    xr = x.reshape(B, D // 3, 3).astype(jnp.float32)
    xhr = x_hat.reshape(B, D // 3, 3).astype(jnp.float32)
    norm = jnp.linalg.norm(xhr - xr, axis=2)
    loss = jnp.sqrt(jnp.mean(norm ** 2, axis=1))
    if reduction == "mean":
        loss = jnp.mean(loss)
    return loss


if __name__ == "__main__":
    key = jax.random.PRNGKey(0)
    ks = jax.random.split(key, 8)

    # 1) Tiny shape, single block: batch=4, 16 "atoms" x 3 coords -> D=48.
    B, D = 4, 48
    x = jax.random.normal(ks[0], (B, D), dtype=jnp.float32)
    x_hat = jax.random.normal(ks[1], (B, D), dtype=jnp.float32)
    out_mean = jax.block_until_ready(rmsd_loss(x, x_hat, "mean"))
    out_none = jax.block_until_ready(rmsd_loss(x, x_hat, "none"))
    assert jnp.allclose(out_mean, _rmsd_ref(x, x_hat, "mean"), atol=1e-5, rtol=1e-5)
    assert jnp.allclose(out_none, _rmsd_ref(x, x_hat, "none"), atol=1e-5, rtol=1e-5)

    # 2) Multi-step batch tiling with a padded last block (B % TB != 0).
    B2, D2 = 20, 96
    x2 = jax.random.normal(ks[2], (B2, D2), dtype=jnp.float32)
    x2h = jax.random.normal(ks[3], (B2, D2), dtype=jnp.float32)
    m2 = jax.block_until_ready(rmsd_loss(x2, x2h, "mean", _max_rows_per_tile=8))
    n2 = jax.block_until_ready(rmsd_loss(x2, x2h, "none", _max_rows_per_tile=8))
    assert jnp.allclose(m2, _rmsd_ref(x2, x2h, "mean"), atol=1e-5, rtol=1e-5)
    assert jnp.allclose(n2, _rmsd_ref(x2, x2h, "none"), atol=1e-5, rtol=1e-5)

    # 3) Forced D-split path (second reduction grid axis + column mask):
    #    288 % 128 != 0 exercises the lane mask, 20 % 8 != 0 the batch padding.
    B3, D3 = 20, 288
    x3 = jax.random.normal(ks[4], (B3, D3), dtype=jnp.float32)
    x3h = jax.random.normal(ks[5], (B3, D3), dtype=jnp.float32)
    m3 = jax.block_until_ready(
        rmsd_loss(x3, x3h, "mean", _max_rows_per_tile=8, _max_cols_per_tile=128))
    n3 = jax.block_until_ready(
        rmsd_loss(x3, x3h, "none", _max_rows_per_tile=8, _max_cols_per_tile=128))
    assert jnp.allclose(m3, _rmsd_ref(x3, x3h, "mean"), atol=1e-5, rtol=1e-5)
    assert jnp.allclose(n3, _rmsd_ref(x3, x3h, "none"), atol=1e-5, rtol=1e-5)

    # 4) bf16 inputs (in-kernel f32 accumulation).
    B4, D4 = 16, 96
    x4 = jax.random.normal(ks[6], (B4, D4), dtype=jnp.bfloat16)
    x4h = jax.random.normal(ks[7], (B4, D4), dtype=jnp.bfloat16)
    m4 = jax.block_until_ready(rmsd_loss(x4, x4h, "mean"))
    n4 = jax.block_until_ready(rmsd_loss(x4, x4h, "none"))
    assert jnp.allclose(m4, _rmsd_ref(x4, x4h, "mean"), atol=1e-4, rtol=1e-4)
    assert jnp.allclose(n4, _rmsd_ref(x4, x4h, "none"), atol=1e-4, rtol=1e-4)

    print("KERNEL_OK")
</pallas_src>

<mosaic_0001>
module attributes {stable_mosaic.version = 11 : i64} {
  func.func @_rmsd_mean_kernel(%arg0: i32, %arg1: memref<4x48xf32, #tpu.memory_space<vmem>>, %arg2: memref<4x48xf32, #tpu.memory_space<vmem>>, %arg3: memref<1x1xf32, #tpu.memory_space<vmem>>, %arg4: memref<1x1xf32, #tpu.memory_space<vmem>>) attributes {dimension_semantics = [#tpu.dimension_semantics<arbitrary>], iteration_bounds = array<i64: 1>, scalar_prefetch = 0 : i64, scratch_operands = 1 : i64, tpu.core_type = #tpu.core_type<tc>, window_params = [{transform_indices = @transform_0, window_bounds = array<i64: 4, 48>}, {transform_indices = @transform_1, window_bounds = array<i64: 4, 48>}, {pipeline_mode = #tpu.pipeline_mode<synchronous>, transform_indices = @transform_2, window_bounds = array<i64: 1, 1>}]} {
    %c0_i32 = arith.constant 0 : i32
    %0 = arith.cmpi eq, %arg0, %c0_i32 : i32
    %1 = arith.extui %0 : i1 to i32
    %c0_i32_0 = arith.constant 0 : i32
    %2 = arith.cmpi ne, %1, %c0_i32_0 : i32
    scf.if %2 {
      %cst_12 = arith.constant 0.000000e+00 : f32
      %20 = vector.broadcast %cst_12 : f32 to vector<1x1xf32>
      %c0_13 = arith.constant 0 : index
      %c0_14 = arith.constant 0 : index
      %21 = vector.load %arg4[%c0_13, %c0_14] : memref<1x1xf32, #tpu.memory_space<vmem>>, vector<1x1xf32>
      tpu.vector_store %arg4[%c0_13, %c0_14], %20 {strides = array<i32>} : memref<1x1xf32, #tpu.memory_space<vmem>>, vector<1x1xf32>,
    } else {
    }
    %c0 = arith.constant 0 : index
    %c0_1 = arith.constant 0 : index
    %3 = vector.load %arg1[%c0, %c0_1] : memref<4x48xf32, #tpu.memory_space<vmem>>, vector<4x48xf32>
    %c0_2 = arith.constant 0 : index
    %c0_3 = arith.constant 0 : index
    %4 = vector.load %arg2[%c0_2, %c0_3] : memref<4x48xf32, #tpu.memory_space<vmem>>, vector<4x48xf32>
    %5 = arith.subf %4, %3 : vector<4x48xf32>
    %6 = arith.mulf %5, %5 : vector<4x48xf32>
    %cst = arith.constant dense<0.000000e+00> : vector<4xf32>
    %7 = vector.multi_reduction <add>, %6, %cst [1] : vector<4x48xf32> to vector<4xf32>
    %8 = vector.shape_cast %7 : vector<4xf32> to vector<4x1xf32>
    %cst_4 = arith.constant 6.250000e-02 : f32
    %9 = vector.broadcast %cst_4 : f32 to vector<4x1xf32>
    %10 = arith.mulf %8, %9 : vector<4x1xf32>
    %11 = math.sqrt %10 : vector<4x1xf32>
    %c0_5 = arith.constant 0 : index
    %c0_6 = arith.constant 0 : index
    %12 = vector.load %arg4[%c0_5, %c0_6] : memref<1x1xf32, #tpu.memory_space<vmem>>, vector<1x1xf32>
    %cst_7 = arith.constant dense<0.000000e+00> : vector<1xf32>
    %13 = vector.multi_reduction <add>, %11, %cst_7 [0] : vector<4x1xf32> to vector<1xf32>
    %14 = vector.shape_cast %13 : vector<1xf32> to vector<1x1xf32>
    %15 = arith.addf %12, %14 : vector<1x1xf32>
    %c0_8 = arith.constant 0 : index
    %c0_9 = arith.constant 0 : index
    %16 = vector.load %arg4[%c0_8, %c0_9] : memref<1x1xf32, #tpu.memory_space<vmem>>, vector<1x1xf32>
    tpu.vector_store %arg4[%c0_8, %c0_9], %15 {strides = array<i32>} : memref<1x1xf32, #tpu.memory_space<vmem>>, vector<1x1xf32>,
    %c0_i32_10 = arith.constant 0 : i32
    %17 = arith.cmpi eq, %arg0, %c0_i32_10 : i32
    %18 = arith.extui %17 : i1 to i32
    %c0_i32_11 = arith.constant 0 : i32
    %19 = arith.cmpi ne, %18, %c0_i32_11 : i32
    scf.if %19 {
      %c0_12 = arith.constant 0 : index
      %c0_13 = arith.constant 0 : index
      %20 = vector.load %arg4[%c0_12, %c0_13] : memref<1x1xf32, #tpu.memory_space<vmem>>, vector<1x1xf32>
      %cst_14 = arith.constant 2.500000e-01 : f32
      %21 = vector.broadcast %cst_14 : f32 to vector<1x1xf32>
      %22 = arith.mulf %20, %21 : vector<1x1xf32>
      %c0_15 = arith.constant 0 : index
      %c0_16 = arith.constant 0 : index
      %23 = vector.load %arg3[%c0_15, %c0_16] : memref<1x1xf32, #tpu.memory_space<vmem>>, vector<1x1xf32>
      tpu.vector_store %arg3[%c0_15, %c0_16], %22 {strides = array<i32>} : memref<1x1xf32, #tpu.memory_space<vmem>>, vector<1x1xf32>,
    } else {
    }
    return
  }
  func.func @transform_0(%arg0: i32) -> (i32, i32) {
    %c0_i32 = arith.constant 0 : i32
    %c0_i32_0 = arith.constant 0 : i32
    return %arg0, %c0_i32 : i32, i32
  }
  func.func @transform_1(%arg0: i32) -> (i32, i32) {
    %c0_i32 = arith.constant 0 : i32
    %c0_i32_0 = arith.constant 0 : i32
    return %arg0, %c0_i32 : i32, i32
  }
  func.func @transform_2(%arg0: i32) -> (i32, i32) {
    %c0_i32 = arith.constant 0 : i32
    %c0_i32_0 = arith.constant 0 : i32
    %c0_i32_1 = arith.constant 0 : i32
    return %c0_i32, %c0_i32_0 : i32, i32
  }
}

</mosaic_0001>

<bundles_post_ra>
// kernel: tpu_custom_call.1
= control target key start
LH: loop header
LB: loop body
LE: loop exit
PB: predicated region body
PF: predicated region fallthrough
CT: control target
= control target key end

     0   :  { %7 = vsyncpa [#allocation4], 0  ;;  %s195_s0 = inlined_call_operand.hbm [shape: f32[4,48], index: 0, kind: input, shape index: {}]   ;;  %s196_s1 = inlined_call_operand.hbm [shape: f32[4,48], index: 1, kind: input, shape index: {}]   ;;  %s197_s2 = inlined_call_operand.hbm [shape: f32[1,1], index: 2, kind: output, shape index: {}]  }
   0x1   :  { %8 = vsyncpa [#allocation7], 0 }
   0x2   :  { %9 = vsyncpa [#allocation5], 0  ;;  %s164_s9 = smov [#allocation3]   ;;  %s165_s11 = smov [#allocation6]  }
   0x3   :  { %s16_s10 = sshll.u32 %s164_s9, 4  ;;  %s26_s12 = sshll.u32 %s165_s11, 4  ;;  %s17_s10 = int_to_ptr.vmem [resolvable:$true] %s16_s10  ;;  %s27_s12 = int_to_ptr.vmem [resolvable:$true] %s26_s12 }
   0x4   :  { %s106_s13 = scalar_lea.vmem %s17_s10, 64  ;;  %p111_p1 = scmp.lt.s32.totalorder %s17_s10, %s17_s10 }
   0x5   :  { %p107_p0 = scmp.ne.s32.totalorder %s17_s10, %s106_s13  ;;  %p112_p2 = scmp.lt.s32.totalorder %s106_s13, %s106_s13 }
   0x7   :  { %p113_p3 = por %p112_p2, %p111_p1 }
   0x9   :  { %p114_p4 = pnand %p113_p3, %p107_p0 }
   0xb   :  { %117 = shalt.err (!%p114_p4)
}
   0xc   :  { %19 = dma.hbm_to_vmem [thread:$0]  %s195_s0, 64, %s17_s10, [#allocation4]  }
   0xd   :  { %s126_s16 = scalar_lea.vmem %s27_s12, 64  ;;  %p131_p6 = scmp.lt.s32.totalorder %s27_s12, %s27_s12 }
   0xe   :  { %p127_p5 = scmp.ne.s32.totalorder %s27_s12, %s126_s16  ;;  %p132_p7 = scmp.lt.s32.totalorder %s126_s16, %s126_s16 }
  0x10   :  { %p133_p8 = por %p132_p7, %p131_p6 }
  0x12   :  { %p134_p9 = pnand %p133_p8, %p127_p5 }
  0x14   :  { %137 = shalt.err (!%p134_p9)
}
  0x15   :  { %29 = dma.hbm_to_vmem [thread:$0]  %s196_s1, 64, %s27_s12, [#allocation7]  }
  0x16   :  { %158 = dma.done.wait [#allocation4], 64  }
  0x17   :  { %159 = vsyncadd [#allocation4], 4294967232 }
  0x18   :  { %160 = dma.done.wait [#allocation7], 64  }
  0x19   :  { %161 = vsyncadd [#allocation7], 4294967232  ;;  %v42_v0 = vld [vmem:[#allocation3] sm:$0xf]  ;;  %v43_v1 = vld [vmem:[#allocation6] sm:$0xf] }
  0x1a   :  { %v44_v2 = vsub.f32 %v43_v1, %v42_v0  ;;  %vm46_vm0 = vcmask 388096   ;;  %vm40_vm1 = vcmask 0   ;;  %v166_v5 = vmov 0.0   ;;  %s167_s0 = smov [#allocation8]  }
  0x1b   :  { %41 = vst.msk [vmem:[#allocation2] sm:$0x1] %vm40_vm1, %v166_v5  ;;  %vm59_vm3 = vcmask 1043456   ;;  %s82_s1 = sshll.u32 %s167_s0, 4  ;;  %s83_s1 = int_to_ptr.vmem [resolvable:$true] %s82_s1 }
  0x1c   :  { %v45_v3 = vmul.f32 %v44_v2, %v44_v2  ;;  %s138_s19 = scalar_lea.vmem %s83_s1, 16  ;;  %s142_s20 = scalar_lea.vmem %s83_s1, 32 }
  0x1d   :  { %p139_p10 = scmp.ne.s32.totalorder %s83_s1, %s138_s19  ;;  %p143_p11 = scmp.lt.s32.totalorder %s83_s1, %s83_s1 }
  0x1e   :  { %v47_v4 = vsel %vm46_vm0, %v45_v3, 0.0  ;;  %p144_p12 = scmp.lt.s32.totalorder %s142_s20, %s138_s19 }
  0x1f   :  { %48 = vadd.xlane.f32.xlu0 %v47_v4 }
  0x20   :  { %p145_p13 = por %p144_p12, %p143_p11 }
  0x22   :  { %v58_v19 = vld [vmem:[#allocation2] sm:$0x1]  ;;  %p146_p0 = pnand %p145_p13, %p139_p10 }
  0xa8   :  { %v49_v6 = vpop.xlane.xlu0 %48 }
  0xa9   :  { %v50_v7 = vmul.f32 0.0625, %v49_v6 }
  0xab   :  { %96 = vrsqrt.f32 %v50_v7  ;;  %vm53_vm2 = vcmp.eq.f32.partialorder %v50_v7, inf  ;;  %v56_v10 = vand.u32 2147483648, %v50_v7  ;;  %vm55_vm4 = vcmp.eq.f32.partialorder %v50_v7, 0.0 }
  0xb8   :  { %v97_v8 = vpop.eup %96 }
  0xb9   :  { %v52_v9 = vmul.f32 %v97_v8, %v50_v7 }
  0xbb   :  { %v54_v11 = vsel %vm53_vm2, %v50_v7, %v52_v9 }
  0xbc   :  { %v57_v12 = vsel %vm55_vm4, %v56_v10, %v54_v11 }
  0xbd   :  { %v60_v13 = vsel %vm59_vm3, %v57_v12, 0.0 }
  0xbe   :  { %v61_v14 = vrot.slane %v60_v13, 4 }
  0xc0   :  { %v62_v15 = vadd.f32 %v61_v14, %v60_v13 }
  0xc2   :  { %v63_v16 = vrot.slane %v62_v15, 2 }
  0xc4   :  { %v64_v17 = vadd.f32 %v63_v16, %v62_v15 }
  0xc6   :  { %v65_v18 = vrot.slane %v64_v17, 1 }
  0xc8   :  { %v66_v20 = vadd.f32 %v65_v18, %v64_v17 }
  0xca   :  { %v67_v21 = vadd.f32 %v66_v20, %v58_v19 }
  0xcc   :  { %69 = vst.msk [vmem:[#allocation2] sm:$0x1] %vm40_vm1, %v67_v21 }
  0xd3   :  { %v73_v22 = vld [vmem:[#allocation2] sm:$0x1] }
  0xd4   :  { %v74_v23 = vmul.f32 0.25, %v73_v22 }
  0xd6   :  { %75 = vst.msk [vmem:[#allocation8] sm:$0x1] %vm40_vm1, %v74_v23 }
  0xd7   :  { %149 = shalt.err (!%p146_p0)
}
  0xd8   :  { %85 = dma.vmem_to_hbm [thread:$0]  %s83_s1, 16, %s197_s2, [#allocation5]  }
  0xd9   :  { %162 = dma.done.wait [#allocation5], 16  }
  0xda   :  { %163 = vsyncadd [#allocation5], 4294967280 }
  0xdb   :  { %89 = vsyncpa [#allocation4], 1 }
  0xdc   :  { %90 = vsyncpa [#allocation7], 1 }
  0xdd   :  { %91 = vsyncpa [#allocation5], 1 }

</bundles_post_ra>
